<compile_context>
chip_gen: v5e
topology: v5e:2x2
jax: 0.10.0
libtpu: 0.0.40
codegen_flags: <defaults>
</compile_context>

<pallas_src>
import functools

import jax
import jax.numpy as jnp
from jax.experimental import pallas as pl
from jax.experimental.pallas import tpu as pltpu

ACTION_PAD = 128  # lane-dense decoder output width


def _make_rnn_agent_kernel(num_layers: int, seq: int, batch: int):
    """Builds a Pallas kernel closure for static (num_layers, seq, batch)."""

    def kernel(*refs):
        # ref unpacking (order matches the wrapper below)
        x_ref = refs[0]                          # (seq*batch, input)   time-major flat
        h0_ref = refs[1]                         # (num_layers, batch, state)
        w_refs = refs[2:2 + 3 * num_layers]      # per layer: w_ih_T, w_hh_T, bias(1,state)
        w_dec_ref = refs[2 + 3 * num_layers]     # (state, ACTION_PAD)  zero-padded
        b_dec_ref = refs[3 + 3 * num_layers]     # (1, ACTION_PAD)      zero-padded
        y_ref = refs[4 + 3 * num_layers]         # out: (seq*batch, ACTION_PAD)
        hn_ref = refs[5 + 3 * num_layers]        # out: (num_layers, batch, state)
        hseq_ref = refs[6 + 3 * num_layers]      # VMEM scratch: (seq*batch, state)

        for l in range(num_layers):
            w_ih = w_refs[3 * l][...]            # (in_dim, state)
            w_hh = w_refs[3 * l + 1][...]        # (state, state)
            bias = w_refs[3 * l + 2][...]        # (1, state) == b_ih + b_hh

            # Full read before the recurrence overwrites hseq_ref (safe: value is
            # materialized by program order of ref effects).
            inp = x_ref[...] if l == 0 else hseq_ref[...]          # (seq*batch, in_dim)

            # Hoisted input projection + bias: one well-utilized MXU matmul that is
            # OFF the serial critical path.  Bias broadcast happens once per layer.
            pre = jnp.dot(inp, w_ih, preferred_element_type=jnp.float32) + bias

            h = h0_ref[l]                                          # (batch, state)
            # Fully-unrolled serial recurrence: only h @ W_hh + tanh on the chain.
            for t in range(seq):
                h = jnp.tanh(
                    pre[t * batch:(t + 1) * batch, :]
                    + jnp.dot(h, w_hh, preferred_element_type=jnp.float32)
                )
                hseq_ref[t * batch:(t + 1) * batch, :] = h
            hn_ref[l] = h

        # Action decoder on the flat (seq*batch, state) slab.  ACTION_PAD=128 keeps
        # the output stores lane-dense (no masked vst on a 4-wide last dim).
        y_ref[...] = (
            jnp.dot(hseq_ref[...], w_dec_ref[...], preferred_element_type=jnp.float32)
            + b_dec_ref[...]
        )

    return kernel


def init_rnn_agent_params(key, input_size, state_size, action_space_size, num_layers):
    """Deterministic parameter init in PyTorch layout (weight_ih: (state, in), etc.)."""
    params = {"w_ih": [], "w_hh": [], "b_ih": [], "b_hh": []}
    bound = 1.0 / jnp.sqrt(jnp.float32(state_size))
    for l in range(num_layers):
        in_dim = input_size if l == 0 else state_size
        key, k1, k2, k3, k4 = jax.random.split(key, 5)
        params["w_ih"].append(jax.random.uniform(k1, (state_size, in_dim), jnp.float32, -bound, bound))
        params["w_hh"].append(jax.random.uniform(k2, (state_size, state_size), jnp.float32, -bound, bound))
        params["b_ih"].append(jax.random.uniform(k3, (state_size,), jnp.float32, -bound, bound))
        params["b_hh"].append(jax.random.uniform(k4, (state_size,), jnp.float32, -bound, bound))
    key, k5, k6 = jax.random.split(key, 3)
    params["w_dec"] = jax.random.uniform(k5, (action_space_size, state_size), jnp.float32, -bound, bound)
    params["b_dec"] = jax.random.uniform(k6, (action_space_size,), jnp.float32, -bound, bound)
    return params


def prepare_rnn_agent_params(params, action_pad: int = ACTION_PAD):
    """One-time conversion of PyTorch-layout params into kernel layout.

    Transposes weights, sums the two biases, and zero-pads the decoder to a
    lane-dense width.  Done once, NOT per forward call.
    """
    num_layers = len(params["w_ih"])
    state = params["w_hh"][0].shape[0]
    action = params["w_dec"].shape[0]
    flat = []
    for l in range(num_layers):
        flat.append(jnp.transpose(params["w_ih"][l]).astype(jnp.float32))       # (in_dim, state)
        flat.append(jnp.transpose(params["w_hh"][l]).astype(jnp.float32))       # (state, state)
        flat.append((params["b_ih"][l] + params["b_hh"][l]).reshape(1, state).astype(jnp.float32))
    w_dec_pad = jnp.zeros((state, action_pad), jnp.float32).at[:, :action].set(
        jnp.transpose(params["w_dec"]).astype(jnp.float32))
    b_dec_pad = jnp.zeros((1, action_pad), jnp.float32).at[0, :action].set(
        params["b_dec"].astype(jnp.float32))
    flat.append(w_dec_pad)
    flat.append(b_dec_pad)
    return tuple(flat)


@functools.partial(jax.jit, static_argnames=("action_size",))
def rnn_agent_forward(inputs, hidden_state, prepared, *, action_size):
    """Pallas-backed forward.

    inputs:       (batch, seq, input_size)   float32
    hidden_state: (num_layers, batch, state) float32
    prepared:     tuple from prepare_rnn_agent_params (kernel-layout weights)
    returns (logits (batch, seq, action), hidden_state (num_layers, batch, state))
    """
    prepared = tuple(prepared)
    num_layers = (len(prepared) - 2) // 3
    batch, seq, input_size = inputs.shape
    state = hidden_state.shape[-1]
    a_pad = prepared[-1].shape[-1]

    # Tiny time-major flatten (seq*batch*input floats); keeps every in-kernel slice a
    # simple static 2-D slice.
    x_flat = jnp.transpose(inputs.astype(jnp.float32), (1, 0, 2)).reshape(seq * batch, input_size)

    flat_args = (x_flat, hidden_state.astype(jnp.float32)) + prepared

    # Advisory cost estimate so XLA can schedule the surrounding (tiny) ops sensibly.
    flops = 0
    in_dim = input_size
    for _ in range(num_layers):
        flops += 2 * seq * batch * state * (in_dim + state)
        in_dim = state
    flops += 2 * seq * batch * state * a_pad
    bytes_accessed = 4 * (sum(int(a.size) for a in flat_args)
                          + seq * batch * a_pad + num_layers * batch * state)

    vmem = pl.BlockSpec(memory_space=pltpu.MemorySpace.VMEM)

    y_pad, h_n = pl.pallas_call(
        _make_rnn_agent_kernel(num_layers, seq, batch),
        out_shape=(
            jax.ShapeDtypeStruct((seq * batch, a_pad), jnp.float32),
            jax.ShapeDtypeStruct((num_layers, batch, state), jnp.float32),
        ),
        in_specs=[vmem] * len(flat_args),
        out_specs=(vmem, vmem),
        scratch_shapes=[pltpu.VMEM((seq * batch, state), jnp.float32)],
        cost_estimate=pl.CostEstimate(
            flops=flops,
            transcendentals=num_layers * seq * batch * state,
            bytes_accessed=bytes_accessed,
        ),
    )(*flat_args)

    # Slice off the lane padding and return PyTorch's (batch, seq, action) layout.
    logits = jnp.transpose(y_pad[:, :action_size].reshape(seq, batch, action_size), (1, 0, 2))
    return logits, h_n


def rnn_agent_reference(inputs, hidden_state, params, num_layers):
    """Pure-JAX reference matching torch.nn.RNN(batch_first=True) + Linear."""
    x = inputs
    seq = x.shape[1]
    h_finals = []
    for l in range(num_layers):
        w_ih, w_hh = params["w_ih"][l], params["w_hh"][l]
        b_ih, b_hh = params["b_ih"][l], params["b_hh"][l]
        h = hidden_state[l]
        outs = []
        for t in range(seq):
            h = jnp.tanh(x[:, t] @ w_ih.T + b_ih + h @ w_hh.T + b_hh)
            outs.append(h)
        x = jnp.stack(outs, axis=1)
        h_finals.append(h)
    y = x @ params["w_dec"].T + params["b_dec"]
    return y, jnp.stack(h_finals)


if __name__ == "__main__":
    # Small shapes consistent with the module's forward:
    batch, seq = 2, 8
    input_size, state_size, action_space_size, num_layers = 16, 32, 4, 2

    key = jax.random.PRNGKey(0)
    key, k_in = jax.random.split(key)
    inputs = jax.random.normal(k_in, (batch, seq, input_size), jnp.float32)
    # RNNAgent.init_hidden -> zeros(num_layers, batch, state_size)
    hidden0 = jnp.zeros((num_layers, batch, state_size), jnp.float32)

    params = init_rnn_agent_params(key, input_size, state_size, action_space_size, num_layers)
    prepared = prepare_rnn_agent_params(params)   # one-time kernel-layout prep

    logits, h_n = rnn_agent_forward(inputs, hidden0, prepared, action_size=action_space_size)
    jax.block_until_ready((logits, h_n))

    ref_logits, ref_h_n = rnn_agent_reference(inputs, hidden0, params, num_layers)
    assert logits.shape == (batch, seq, action_space_size)
    assert h_n.shape == (num_layers, batch, state_size)
    assert jnp.allclose(logits, ref_logits, atol=1e-5, rtol=1e-5)
    assert jnp.allclose(h_n, ref_h_n, atol=1e-5, rtol=1e-5)

    print("KERNEL_OK")
</pallas_src>

<mosaic_0001>
module attributes {stable_mosaic.version = 11 : i64} {
  func.func @kernel(%arg0: memref<16x16xf32, #tpu.memory_space<vmem>>, %arg1: memref<2x2x32xf32, #tpu.memory_space<vmem>>, %arg2: memref<16x32xf32, #tpu.memory_space<vmem>>, %arg3: memref<32x32xf32, #tpu.memory_space<vmem>>, %arg4: memref<1x32xf32, #tpu.memory_space<vmem>>, %arg5: memref<32x32xf32, #tpu.memory_space<vmem>>, %arg6: memref<32x32xf32, #tpu.memory_space<vmem>>, %arg7: memref<1x32xf32, #tpu.memory_space<vmem>>, %arg8: memref<32x128xf32, #tpu.memory_space<vmem>>, %arg9: memref<1x128xf32, #tpu.memory_space<vmem>>, %arg10: memref<16x128xf32, #tpu.memory_space<vmem>>, %arg11: memref<2x2x32xf32, #tpu.memory_space<vmem>>, %arg12: memref<16x32xf32, #tpu.memory_space<vmem>>) attributes {dimension_semantics = [], scalar_prefetch = 0 : i64, scratch_operands = 1 : i64, tpu.core_type = #tpu.core_type<tc>} {
    %c0 = arith.constant 0 : index
    %c0_0 = arith.constant 0 : index
    %0 = vector.load %arg2[%c0, %c0_0] : memref<16x32xf32, #tpu.memory_space<vmem>>, vector<16x32xf32>
    %c0_1 = arith.constant 0 : index
    %c0_2 = arith.constant 0 : index
    %1 = vector.load %arg3[%c0_1, %c0_2] : memref<32x32xf32, #tpu.memory_space<vmem>>, vector<32x32xf32>
    %c0_3 = arith.constant 0 : index
    %c0_4 = arith.constant 0 : index
    %2 = vector.load %arg4[%c0_3, %c0_4] : memref<1x32xf32, #tpu.memory_space<vmem>>, vector<1x32xf32>
    %c0_5 = arith.constant 0 : index
    %c0_6 = arith.constant 0 : index
    %3 = vector.load %arg0[%c0_5, %c0_6] : memref<16x16xf32, #tpu.memory_space<vmem>>, vector<16x16xf32>
    %cst = arith.constant dense<0.000000e+00> : vector<16x32xf32>
    %4 = tpu.matmul %3, %0, %cst {dimension_numbers = #tpu.dot_dimension_numbers<[1], [0], [0], [1], [0, 0, 1, 1], [], []>} : vector<16x16xf32>, vector<16x32xf32>, vector<16x32xf32> -> vector<16x32xf32>
    %5 = vector.broadcast %2 : vector<1x32xf32> to vector<16x32xf32>
    %6 = arith.addf %4, %5 : vector<16x32xf32>
    %c0_7 = arith.constant 0 : index
    %c0_8 = arith.constant 0 : index
    %c0_9 = arith.constant 0 : index
    %7 = vector.load %arg1[%c0_7, %c0_8, %c0_9] : memref<2x2x32xf32, #tpu.memory_space<vmem>>, vector<1x2x32xf32>
    %8 = vector.shape_cast %7 : vector<1x2x32xf32> to vector<2x32xf32>
    %9 = vector.extract_strided_slice %6 {offsets = [0, 0], sizes = [2, 32], strides = [1, 1]} : vector<16x32xf32> to vector<2x32xf32>
    %cst_10 = arith.constant dense<0.000000e+00> : vector<2x32xf32>
    %10 = tpu.matmul %8, %1, %cst_10 {dimension_numbers = #tpu.dot_dimension_numbers<[1], [0], [0], [1], [0, 0, 1, 1], [], []>} : vector<2x32xf32>, vector<32x32xf32>, vector<2x32xf32> -> vector<2x32xf32>
    %11 = arith.addf %9, %10 : vector<2x32xf32>
    %12 = math.tanh %11 : vector<2x32xf32>
    %c0_11 = arith.constant 0 : index
    %c0_12 = arith.constant 0 : index
    %13 = vector.load %arg12[%c0_11, %c0_12] : memref<16x32xf32, #tpu.memory_space<vmem>>, vector<2x32xf32>
    tpu.vector_store %arg12[%c0_11, %c0_12], %12 {strides = array<i32>} : memref<16x32xf32, #tpu.memory_space<vmem>>, vector<2x32xf32>,
    %14 = vector.extract_strided_slice %6 {offsets = [2, 0], sizes = [2, 32], strides = [1, 1]} : vector<16x32xf32> to vector<2x32xf32>
    %cst_13 = arith.constant dense<0.000000e+00> : vector<2x32xf32>
    %15 = tpu.matmul %12, %1, %cst_13 {dimension_numbers = #tpu.dot_dimension_numbers<[1], [0], [0], [1], [0, 0, 1, 1], [], []>} : vector<2x32xf32>, vector<32x32xf32>, vector<2x32xf32> -> vector<2x32xf32>
    %16 = arith.addf %14, %15 : vector<2x32xf32>
    %17 = math.tanh %16 : vector<2x32xf32>
    %c2 = arith.constant 2 : index
    %c0_14 = arith.constant 0 : index
    %18 = vector.load %arg12[%c2, %c0_14] : memref<16x32xf32, #tpu.memory_space<vmem>>, vector<2x32xf32>
    tpu.vector_store %arg12[%c2, %c0_14], %17 {strides = array<i32>} : memref<16x32xf32, #tpu.memory_space<vmem>>, vector<2x32xf32>,
    %19 = vector.extract_strided_slice %6 {offsets = [4, 0], sizes = [2, 32], strides = [1, 1]} : vector<16x32xf32> to vector<2x32xf32>
    %cst_15 = arith.constant dense<0.000000e+00> : vector<2x32xf32>
    %20 = tpu.matmul %17, %1, %cst_15 {dimension_numbers = #tpu.dot_dimension_numbers<[1], [0], [0], [1], [0, 0, 1, 1], [], []>} : vector<2x32xf32>, vector<32x32xf32>, vector<2x32xf32> -> vector<2x32xf32>
    %21 = arith.addf %19, %20 : vector<2x32xf32>
    %22 = math.tanh %21 : vector<2x32xf32>
    %c4 = arith.constant 4 : index
    %c0_16 = arith.constant 0 : index
    %23 = vector.load %arg12[%c4, %c0_16] : memref<16x32xf32, #tpu.memory_space<vmem>>, vector<2x32xf32>
    tpu.vector_store %arg12[%c4, %c0_16], %22 {strides = array<i32>} : memref<16x32xf32, #tpu.memory_space<vmem>>, vector<2x32xf32>,
    %24 = vector.extract_strided_slice %6 {offsets = [6, 0], sizes = [2, 32], strides = [1, 1]} : vector<16x32xf32> to vector<2x32xf32>
    %cst_17 = arith.constant dense<0.000000e+00> : vector<2x32xf32>
    %25 = tpu.matmul %22, %1, %cst_17 {dimension_numbers = #tpu.dot_dimension_numbers<[1], [0], [0], [1], [0, 0, 1, 1], [], []>} : vector<2x32xf32>, vector<32x32xf32>, vector<2x32xf32> -> vector<2x32xf32>
    %26 = arith.addf %24, %25 : vector<2x32xf32>
    %27 = math.tanh %26 : vector<2x32xf32>
    %c6 = arith.constant 6 : index
    %c0_18 = arith.constant 0 : index
    %28 = vector.load %arg12[%c6, %c0_18] : memref<16x32xf32, #tpu.memory_space<vmem>>, vector<2x32xf32>
    tpu.vector_store %arg12[%c6, %c0_18], %27 {strides = array<i32>} : memref<16x32xf32, #tpu.memory_space<vmem>>, vector<2x32xf32>,
    %29 = vector.extract_strided_slice %6 {offsets = [8, 0], sizes = [2, 32], strides = [1, 1]} : vector<16x32xf32> to vector<2x32xf32>
    %cst_19 = arith.constant dense<0.000000e+00> : vector<2x32xf32>
    %30 = tpu.matmul %27, %1, %cst_19 {dimension_numbers = #tpu.dot_dimension_numbers<[1], [0], [0], [1], [0, 0, 1, 1], [], []>} : vector<2x32xf32>, vector<32x32xf32>, vector<2x32xf32> -> vector<2x32xf32>
    %31 = arith.addf %29, %30 : vector<2x32xf32>
    %32 = math.tanh %31 : vector<2x32xf32>
    %c8 = arith.constant 8 : index
    %c0_20 = arith.constant 0 : index
    %33 = vector.load %arg12[%c8, %c0_20] : memref<16x32xf32, #tpu.memory_space<vmem>>, vector<2x32xf32>
    tpu.vector_store %arg12[%c8, %c0_20], %32 {strides = array<i32>} : memref<16x32xf32, #tpu.memory_space<vmem>>, vector<2x32xf32>,
    %34 = vector.extract_strided_slice %6 {offsets = [10, 0], sizes = [2, 32], strides = [1, 1]} : vector<16x32xf32> to vector<2x32xf32>
    %cst_21 = arith.constant dense<0.000000e+00> : vector<2x32xf32>
    %35 = tpu.matmul %32, %1, %cst_21 {dimension_numbers = #tpu.dot_dimension_numbers<[1], [0], [0], [1], [0, 0, 1, 1], [], []>} : vector<2x32xf32>, vector<32x32xf32>, vector<2x32xf32> -> vector<2x32xf32>
    %36 = arith.addf %34, %35 : vector<2x32xf32>
    %37 = math.tanh %36 : vector<2x32xf32>
    %c10 = arith.constant 10 : index
    %c0_22 = arith.constant 0 : index
    %38 = vector.load %arg12[%c10, %c0_22] : memref<16x32xf32, #tpu.memory_space<vmem>>, vector<2x32xf32>
    tpu.vector_store %arg12[%c10, %c0_22], %37 {strides = array<i32>} : memref<16x32xf32, #tpu.memory_space<vmem>>, vector<2x32xf32>,
    %39 = vector.extract_strided_slice %6 {offsets = [12, 0], sizes = [2, 32], strides = [1, 1]} : vector<16x32xf32> to vector<2x32xf32>
    %cst_23 = arith.constant dense<0.000000e+00> : vector<2x32xf32>
    %40 = tpu.matmul %37, %1, %cst_23 {dimension_numbers = #tpu.dot_dimension_numbers<[1], [0], [0], [1], [0, 0, 1, 1], [], []>} : vector<2x32xf32>, vector<32x32xf32>, vector<2x32xf32> -> vector<2x32xf32>
    %41 = arith.addf %39, %40 : vector<2x32xf32>
    %42 = math.tanh %41 : vector<2x32xf32>
    %c12 = arith.constant 12 : index
    %c0_24 = arith.constant 0 : index
    %43 = vector.load %arg12[%c12, %c0_24] : memref<16x32xf32, #tpu.memory_space<vmem>>, vector<2x32xf32>
    tpu.vector_store %arg12[%c12, %c0_24], %42 {strides = array<i32>} : memref<16x32xf32, #tpu.memory_space<vmem>>, vector<2x32xf32>,
    %44 = vector.extract_strided_slice %6 {offsets = [14, 0], sizes = [2, 32], strides = [1, 1]} : vector<16x32xf32> to vector<2x32xf32>
    %cst_25 = arith.constant dense<0.000000e+00> : vector<2x32xf32>
    %45 = tpu.matmul %42, %1, %cst_25 {dimension_numbers = #tpu.dot_dimension_numbers<[1], [0], [0], [1], [0, 0, 1, 1], [], []>} : vector<2x32xf32>, vector<32x32xf32>, vector<2x32xf32> -> vector<2x32xf32>
    %46 = arith.addf %44, %45 : vector<2x32xf32>
    %47 = math.tanh %46 : vector<2x32xf32>
    %c14 = arith.constant 14 : index
    %c0_26 = arith.constant 0 : index
    %48 = vector.load %arg12[%c14, %c0_26] : memref<16x32xf32, #tpu.memory_space<vmem>>, vector<2x32xf32>
    tpu.vector_store %arg12[%c14, %c0_26], %47 {strides = array<i32>} : memref<16x32xf32, #tpu.memory_space<vmem>>, vector<2x32xf32>,
    %c0_27 = arith.constant 0 : index
    %c0_28 = arith.constant 0 : index
    %c0_29 = arith.constant 0 : index
    %49 = vector.load %arg11[%c0_27, %c0_28, %c0_29] : memref<2x2x32xf32, #tpu.memory_space<vmem>>, vector<1x2x32xf32>
    %50 = vector.shape_cast %49 : vector<1x2x32xf32> to vector<2x32xf32>
    %51 = vector.shape_cast %47 : vector<2x32xf32> to vector<1x2x32xf32>
    tpu.vector_store %arg11[%c0_27, %c0_28, %c0_29], %51 {strides = array<i32>} : memref<2x2x32xf32, #tpu.memory_space<vmem>>, vector<1x2x32xf32>,
    %c0_30 = arith.constant 0 : index
    %c0_31 = arith.constant 0 : index
    %52 = vector.load %arg5[%c0_30, %c0_31] : memref<32x32xf32, #tpu.memory_space<vmem>>, vector<32x32xf32>
    %c0_32 = arith.constant 0 : index
    %c0_33 = arith.constant 0 : index
    %53 = vector.load %arg6[%c0_32, %c0_33] : memref<32x32xf32, #tpu.memory_space<vmem>>, vector<32x32xf32>
    %c0_34 = arith.constant 0 : index
    %c0_35 = arith.constant 0 : index
    %54 = vector.load %arg7[%c0_34, %c0_35] : memref<1x32xf32, #tpu.memory_space<vmem>>, vector<1x32xf32>
    %c0_36 = arith.constant 0 : index
    %c0_37 = arith.constant 0 : index
    %55 = vector.load %arg12[%c0_36, %c0_37] : memref<16x32xf32, #tpu.memory_space<vmem>>, vector<16x32xf32>
    %cst_38 = arith.constant dense<0.000000e+00> : vector<16x32xf32>
    %56 = tpu.matmul %55, %52, %cst_38 {dimension_numbers = #tpu.dot_dimension_numbers<[1], [0], [0], [1], [0, 0, 1, 1], [], []>} : vector<16x32xf32>, vector<32x32xf32>, vector<16x32xf32> -> vector<16x32xf32>
    %57 = vector.broadcast %54 : vector<1x32xf32> to vector<16x32xf32>
    %58 = arith.addf %56, %57 : vector<16x32xf32>
    %c1 = arith.constant 1 : index
    %c0_39 = arith.constant 0 : index
    %c0_40 = arith.constant 0 : index
    %59 = vector.load %arg1[%c1, %c0_39, %c0_40] : memref<2x2x32xf32, #tpu.memory_space<vmem>>, vector<1x2x32xf32>
    %60 = vector.shape_cast %59 : vector<1x2x32xf32> to vector<2x32xf32>
    %61 = vector.extract_strided_slice %58 {offsets = [0, 0], sizes = [2, 32], strides = [1, 1]} : vector<16x32xf32> to vector<2x32xf32>
    %cst_41 = arith.constant dense<0.000000e+00> : vector<2x32xf32>
    %62 = tpu.matmul %60, %53, %cst_41 {dimension_numbers = #tpu.dot_dimension_numbers<[1], [0], [0], [1], [0, 0, 1, 1], [], []>} : vector<2x32xf32>, vector<32x32xf32>, vector<2x32xf32> -> vector<2x32xf32>
    %63 = arith.addf %61, %62 : vector<2x32xf32>
    %64 = math.tanh %63 : vector<2x32xf32>
    %c0_42 = arith.constant 0 : index
    %c0_43 = arith.constant 0 : index
    %65 = vector.load %arg12[%c0_42, %c0_43] : memref<16x32xf32, #tpu.memory_space<vmem>>, vector<2x32xf32>
    tpu.vector_store %arg12[%c0_42, %c0_43], %64 {strides = array<i32>} : memref<16x32xf32, #tpu.memory_space<vmem>>, vector<2x32xf32>,
    %66 = vector.extract_strided_slice %58 {offsets = [2, 0], sizes = [2, 32], strides = [1, 1]} : vector<16x32xf32> to vector<2x32xf32>
    %cst_44 = arith.constant dense<0.000000e+00> : vector<2x32xf32>
    %67 = tpu.matmul %64, %53, %cst_44 {dimension_numbers = #tpu.dot_dimension_numbers<[1], [0], [0], [1], [0, 0, 1, 1], [], []>} : vector<2x32xf32>, vector<32x32xf32>, vector<2x32xf32> -> vector<2x32xf32>
    %68 = arith.addf %66, %67 : vector<2x32xf32>
    %69 = math.tanh %68 : vector<2x32xf32>
    %c2_45 = arith.constant 2 : index
    %c0_46 = arith.constant 0 : index
    %70 = vector.load %arg12[%c2_45, %c0_46] : memref<16x32xf32, #tpu.memory_space<vmem>>, vector<2x32xf32>
    tpu.vector_store %arg12[%c2_45, %c0_46], %69 {strides = array<i32>} : memref<16x32xf32, #tpu.memory_space<vmem>>, vector<2x32xf32>,
    %71 = vector.extract_strided_slice %58 {offsets = [4, 0], sizes = [2, 32], strides = [1, 1]} : vector<16x32xf32> to vector<2x32xf32>
    %cst_47 = arith.constant dense<0.000000e+00> : vector<2x32xf32>
    %72 = tpu.matmul %69, %53, %cst_47 {dimension_numbers = #tpu.dot_dimension_numbers<[1], [0], [0], [1], [0, 0, 1, 1], [], []>} : vector<2x32xf32>, vector<32x32xf32>, vector<2x32xf32> -> vector<2x32xf32>
    %73 = arith.addf %71, %72 : vector<2x32xf32>
    %74 = math.tanh %73 : vector<2x32xf32>
    %c4_48 = arith.constant 4 : index
    %c0_49 = arith.constant 0 : index
    %75 = vector.load %arg12[%c4_48, %c0_49] : memref<16x32xf32, #tpu.memory_space<vmem>>, vector<2x32xf32>
    tpu.vector_store %arg12[%c4_48, %c0_49], %74 {strides = array<i32>} : memref<16x32xf32, #tpu.memory_space<vmem>>, vector<2x32xf32>,
    %76 = vector.extract_strided_slice %58 {offsets = [6, 0], sizes = [2, 32], strides = [1, 1]} : vector<16x32xf32> to vector<2x32xf32>
    %cst_50 = arith.constant dense<0.000000e+00> : vector<2x32xf32>
    %77 = tpu.matmul %74, %53, %cst_50 {dimension_numbers = #tpu.dot_dimension_numbers<[1], [0], [0], [1], [0, 0, 1, 1], [], []>} : vector<2x32xf32>, vector<32x32xf32>, vector<2x32xf32> -> vector<2x32xf32>
    %78 = arith.addf %76, %77 : vector<2x32xf32>
    %79 = math.tanh %78 : vector<2x32xf32>
    %c6_51 = arith.constant 6 : index
    %c0_52 = arith.constant 0 : index
    %80 = vector.load %arg12[%c6_51, %c0_52] : memref<16x32xf32, #tpu.memory_space<vmem>>, vector<2x32xf32>
    tpu.vector_store %arg12[%c6_51, %c0_52], %79 {strides = array<i32>} : memref<16x32xf32, #tpu.memory_space<vmem>>, vector<2x32xf32>,
    %81 = vector.extract_strided_slice %58 {offsets = [8, 0], sizes = [2, 32], strides = [1, 1]} : vector<16x32xf32> to vector<2x32xf32>
    %cst_53 = arith.constant dense<0.000000e+00> : vector<2x32xf32>
    %82 = tpu.matmul %79, %53, %cst_53 {dimension_numbers = #tpu.dot_dimension_numbers<[1], [0], [0], [1], [0, 0, 1, 1], [], []>} : vector<2x32xf32>, vector<32x32xf32>, vector<2x32xf32> -> vector<2x32xf32>
    %83 = arith.addf %81, %82 : vector<2x32xf32>
    %84 = math.tanh %83 : vector<2x32xf32>
    %c8_54 = arith.constant 8 : index
    %c0_55 = arith.constant 0 : index
    %85 = vector.load %arg12[%c8_54, %c0_55] : memref<16x32xf32, #tpu.memory_space<vmem>>, vector<2x32xf32>
    tpu.vector_store %arg12[%c8_54, %c0_55], %84 {strides = array<i32>} : memref<16x32xf32, #tpu.memory_space<vmem>>, vector<2x32xf32>,
    %86 = vector.extract_strided_slice %58 {offsets = [10, 0], sizes = [2, 32], strides = [1, 1]} : vector<16x32xf32> to vector<2x32xf32>
    %cst_56 = arith.constant dense<0.000000e+00> : vector<2x32xf32>
    %87 = tpu.matmul %84, %53, %cst_56 {dimension_numbers = #tpu.dot_dimension_numbers<[1], [0], [0], [1], [0, 0, 1, 1], [], []>} : vector<2x32xf32>, vector<32x32xf32>, vector<2x32xf32> -> vector<2x32xf32>
    %88 = arith.addf %86, %87 : vector<2x32xf32>
    %89 = math.tanh %88 : vector<2x32xf32>
    %c10_57 = arith.constant 10 : index
    %c0_58 = arith.constant 0 : index
    %90 = vector.load %arg12[%c10_57, %c0_58] : memref<16x32xf32, #tpu.memory_space<vmem>>, vector<2x32xf32>
    tpu.vector_store %arg12[%c10_57, %c0_58], %89 {strides = array<i32>} : memref<16x32xf32, #tpu.memory_space<vmem>>, vector<2x32xf32>,
    %91 = vector.extract_strided_slice %58 {offsets = [12, 0], sizes = [2, 32], strides = [1, 1]} : vector<16x32xf32> to vector<2x32xf32>
    %cst_59 = arith.constant dense<0.000000e+00> : vector<2x32xf32>
    %92 = tpu.matmul %89, %53, %cst_59 {dimension_numbers = #tpu.dot_dimension_numbers<[1], [0], [0], [1], [0, 0, 1, 1], [], []>} : vector<2x32xf32>, vector<32x32xf32>, vector<2x32xf32> -> vector<2x32xf32>
    %93 = arith.addf %91, %92 : vector<2x32xf32>
    %94 = math.tanh %93 : vector<2x32xf32>
    %c12_60 = arith.constant 12 : index
    %c0_61 = arith.constant 0 : index
    %95 = vector.load %arg12[%c12_60, %c0_61] : memref<16x32xf32, #tpu.memory_space<vmem>>, vector<2x32xf32>
    tpu.vector_store %arg12[%c12_60, %c0_61], %94 {strides = array<i32>} : memref<16x32xf32, #tpu.memory_space<vmem>>, vector<2x32xf32>,
    %96 = vector.extract_strided_slice %58 {offsets = [14, 0], sizes = [2, 32], strides = [1, 1]} : vector<16x32xf32> to vector<2x32xf32>
    %cst_62 = arith.constant dense<0.000000e+00> : vector<2x32xf32>
    %97 = tpu.matmul %94, %53, %cst_62 {dimension_numbers = #tpu.dot_dimension_numbers<[1], [0], [0], [1], [0, 0, 1, 1], [], []>} : vector<2x32xf32>, vector<32x32xf32>, vector<2x32xf32> -> vector<2x32xf32>
    %98 = arith.addf %96, %97 : vector<2x32xf32>
    %99 = math.tanh %98 : vector<2x32xf32>
    %c14_63 = arith.constant 14 : index
    %c0_64 = arith.constant 0 : index
    %100 = vector.load %arg12[%c14_63, %c0_64] : memref<16x32xf32, #tpu.memory_space<vmem>>, vector<2x32xf32>
    tpu.vector_store %arg12[%c14_63, %c0_64], %99 {strides = array<i32>} : memref<16x32xf32, #tpu.memory_space<vmem>>, vector<2x32xf32>,
    %c1_65 = arith.constant 1 : index
    %c0_66 = arith.constant 0 : index
    %c0_67 = arith.constant 0 : index
    %101 = vector.load %arg11[%c1_65, %c0_66, %c0_67] : memref<2x2x32xf32, #tpu.memory_space<vmem>>, vector<1x2x32xf32>
    %102 = vector.shape_cast %101 : vector<1x2x32xf32> to vector<2x32xf32>
    %103 = vector.shape_cast %99 : vector<2x32xf32> to vector<1x2x32xf32>
    tpu.vector_store %arg11[%c1_65, %c0_66, %c0_67], %103 {strides = array<i32>} : memref<2x2x32xf32, #tpu.memory_space<vmem>>, vector<1x2x32xf32>,
    %c0_68 = arith.constant 0 : index
    %c0_69 = arith.constant 0 : index
    %104 = vector.load %arg12[%c0_68, %c0_69] : memref<16x32xf32, #tpu.memory_space<vmem>>, vector<16x32xf32>
    %c0_70 = arith.constant 0 : index
    %c0_71 = arith.constant 0 : index
    %105 = vector.load %arg8[%c0_70, %c0_71] : memref<32x128xf32, #tpu.memory_space<vmem>>, vector<32x128xf32>
    %cst_72 = arith.constant dense<0.000000e+00> : vector<16x128xf32>
    %106 = tpu.matmul %104, %105, %cst_72 {dimension_numbers = #tpu.dot_dimension_numbers<[1], [0], [0], [1], [0, 0, 1, 1], [], []>} : vector<16x32xf32>, vector<32x128xf32>, vector<16x128xf32> -> vector<16x128xf32>
    %c0_73 = arith.constant 0 : index
    %c0_74 = arith.constant 0 : index
    %107 = vector.load %arg9[%c0_73, %c0_74] : memref<1x128xf32, #tpu.memory_space<vmem>>, vector<1x128xf32>
    %108 = vector.broadcast %107 : vector<1x128xf32> to vector<16x128xf32>
    %109 = arith.addf %106, %108 : vector<16x128xf32>
    %c0_75 = arith.constant 0 : index
    %c0_76 = arith.constant 0 : index
    %110 = vector.load %arg10[%c0_75, %c0_76] : memref<16x128xf32, #tpu.memory_space<vmem>>, vector<16x128xf32>
    tpu.vector_store %arg10[%c0_75, %c0_76], %109 {strides = array<i32>} : memref<16x128xf32, #tpu.memory_space<vmem>>, vector<16x128xf32>,
    return
  }
}

</mosaic_0001>

<bundles_post_ra>
// kernel: rnn_agent_forward.1
= control target key start
LH: loop header
LB: loop body
LE: loop exit
PB: predicated region body
PF: predicated region fallthrough
CT: control target
= control target key end

     0   :  { %17 = vsyncpa [#allocation4], 0  ;;  %s1133_s0 = inlined_call_operand.vmem [shape: f32[16,16], index: 0, kind: input, shape index: {}]   ;;  %s1134_s1 = inlined_call_operand.vmem [shape: f32[2,2,32], index: 1, kind: input, shape index: {}]   ;;  %s1135_s2 = inlined_call_operand.hbm [shape: f32[16,32], index: 2, kind: input, shape index: {}]   ;;  %s1136_s3 = inlined_call_operand.vmem [shape: f32[32,32], index: 3, kind: input, shape index: {}]   ;;  %s1137_s4 = inlined_call_operand.vmem [shape: f32[1,32], index: 4, kind: input, shape index: {}]   ;;  %s1138_s5 = inlined_call_operand.hbm [shape: f32[32,32], index: 5, kind: input, shape index: {}]   ;;  %s1139_s6 = inlined_call_operand.hbm [shape: f32[32,32], index: 6, kind: input, shape index: {}]   ;;  %s1140_s7 = inlined_call_operand.vmem [shape: f32[1,32], index: 7, kind: input, shape index: {}]   ;;  %s1141_s8 = inlined_call_operand.hbm [shape: f32[32,128], index: 8, kind: input, shape index: {}]   ;;  %s1142_s9 = inlined_call_operand.vmem [shape: f32[1,128], index: 9, kind: input, shape index: {}]   ;;  %s1143_s10 = inlined_call_operand.vmem [shape: f32[16,128], index: 10, kind: output, shape index: {0}]   ;;  %s1144_s11 = inlined_call_operand.hbm [shape: f32[2,2,32], index: 11, kind: output, shape index: {1}]  }
   0x1   :  { %18 = vsyncpa [#allocation7], 0 }
   0x2   :  { %19 = vsyncpa [#allocation10], 0 }
   0x3   :  { %20 = vsyncpa [#allocation5], 0  ;;  %s46_s19 = sshll.u32 %s1138_s5, 4  ;;  %s922_s20 = smov [#allocation6]   ;;  %s47_s19 = int_to_ptr.hbm [resolvable:$true] %s46_s19 }
   0x4   :  { %s48_s21 = sshll.u32 %s922_s20, 4  ;;  %s29_s24 = sshll.u32 %s1135_s2, 4  ;;  %s49_s21 = int_to_ptr.vmem [resolvable:$true] %s48_s21  ;;  %s30_s24 = int_to_ptr.hbm [resolvable:$true] %s29_s24 }
   0x5   :  { %s923_s25 = smov 128   ;;  %s924_s26 = smov 8  }
   0x6   :  { %54 = dma.hbm_to_vmem [thread:$0]  %s47_s19, 512, %s49_s21, [#allocation7], %s923_s25, %s923_s25, %s924_s26  }
   0x7   :  { %s925_s27 = smov [#allocation3]   ;;  %s59_s12 = sshll.u32 %s1139_s6, 4  ;;  %s60_s12 = int_to_ptr.hbm [resolvable:$true] %s59_s12 }
   0x8   :  { %s31_s28 = sshll.u32 %s925_s27, 4  ;;  %s74_s14 = sshll.u32 %s1141_s8, 4  ;;  %s32_s28 = int_to_ptr.vmem [resolvable:$true] %s31_s28  ;;  %s75_s14 = int_to_ptr.hbm [resolvable:$true] %s74_s14 }
   0x9   :  { %37 = dma.hbm_to_vmem [thread:$0]  %s30_s24, 256, %s32_s28, [#allocation4], %s923_s25, %s923_s25, %s924_s26  }
   0xa   :  { %s926_s15 = smov [#allocation8]   ;;  %s927_s2 = smov [#allocation9]  }
   0xb   :  { %s61_s16 = sshll.u32 %s926_s15, 4  ;;  %s76_s17 = sshll.u32 %s927_s2, 4  ;;  %s62_s16 = int_to_ptr.vmem [resolvable:$true] %s61_s16  ;;  %s77_s17 = int_to_ptr.vmem [resolvable:$true] %s76_s17 }
   0xc   :  { %67 = dma.hbm_to_vmem [thread:$0]  %s60_s12, 512, %s62_s16, [#allocation7], %s923_s25, %s923_s25, %s924_s26  }
   0xd   :  { %82 = dma.hbm_to_vmem [thread:$0]  %s75_s14, 512, %s77_s17, [#allocation10], %s923_s25, %s923_s25, %s924_s26  }
   0xe   :  { %914 = dma.done.wait [#allocation4], 256  }
   0xf   :  { %915 = vsyncadd [#allocation4], 4294967040 }
  0x10   :  { %916 = dma.done.wait [#allocation7], 1024  }
  0x11   :  { %917 = vsyncadd [#allocation7], 4294966272 }
  0x12   :  { %918 = dma.done.wait [#allocation10], 512  }
  0x13   :  { %919 = vsyncadd [#allocation10], 4294966784  ;;  %v102_v0 = vld [vmem:[#allocation3 + $0x8] sm:$0xff]  ;;  %v101_v1 = vld [vmem:[#allocation3] sm:$0xff]  ;;  %vm113_vm0 = vcmask 130048   ;;  %vm144_vm1 = vcmask 261120  }
  0x14   :  { %748 = vmatpush.msra.mxu1 %v102_v0  ;;  %v109_v2 = vld [vmem:[%s1133_s0 + $0x8] sm:$0xff]  ;;  %v106_v3 = vld [vmem:[%s1136_s3 + $0x18] sm:$0xff]  ;;  %134 = vmatpush.msra.mxu0 %v102_v0  ;;  %v108_v4 = vld [vmem:[%s1133_s0] sm:$0xff]  ;;  %vm170_vm2 = vcmask 254976   ;;  %vm200_vm3 = vcmask 257026   ;;  %vm231_vm4 = vcmask 259076  }
  0x15   :  { %187 = vmatpush.msra.mxu2 %v106_v3  ;;  %218 = vmatpush.msra.mxu3 %v106_v3  ;;  %v105_v5 = vld [vmem:[%s1136_s3 + $0x10] sm:$0xff]  ;;  %v104_v6 = vld [vmem:[%s1136_s3 + $0x8] sm:$0xff]  ;;  %v103_v7 = vld [vmem:[%s1136_s3] sm:$0xff]  ;;  %vm262_vm5 = vcmask 261126   ;;  %s708_s17 = sshll.u32 %s1144_s11, 4  ;;  %s929_s6 = smov 32   ;;  %s709_s17 = int_to_ptr.hbm [resolvable:$true] %s708_s17 }
  0x16   :  { %749 = vmatpush.msra.mxu1 %v101_v1  ;;  %135 = vmatpush.msra.mxu0 %v101_v1  ;;  %v143_v8 = vld [vmem:[%s1134_s1] sm:$0x3]  ;;  %v384_v27 = vld [vmem:[#allocation6 + $0x18] sm:$0xff]  ;;  %v383_v28 = vld [vmem:[#allocation6 + $0x10] sm:$0xff]  ;;  %s930_s8 = smov 2  }
  0x17   :  { %726 = vmatmul.msk.f32.vlgmr.msra.gmra.mxu1 %vm113_vm0, %v109_v2  ;;  %725 = vmatmul.msk.f32.vlgmr.msra.gmra.mxu0 %vm113_vm0, %v108_v4  ;;  %v759_v9 = vld [vmem:[%s1137_s4] ss:$0 sm:$0xff]  ;;  %v382_v29 = vld [vmem:[#allocation6 + $0x8] sm:$0xff]  ;;  %v1039_v37 = vld [vmem:[#allocation8 + $0x18] sm:$0xff] }
  0x18   :  { %160 = vmatpush.msrb.mxu1 %v106_v3  ;;  %188 = vmatpush.msra.mxu2 %v105_v5  ;;  %v381_v30 = vld [vmem:[#allocation6] sm:$0xff]  ;;  %v1041_v38 = vld [vmem:[#allocation8 + $0x10] sm:$0xff]  ;;  %v1045_v39 = vld [vmem:[#allocation8 + $0x8] sm:$0xff] }
  0x19   :  { %219 = vmatpush.msra.mxu3 %v105_v5  ;;  %336 = vmatpush.msrb.mxu0 %v106_v3  ;;  %v1051_v40 = vld [vmem:[#allocation8] sm:$0xff] }
  0x1a   :  { %161 = vmatpush.msrb.mxu1 %v105_v5  ;;  %189 = vmatpush.msra.mxu2 %v104_v6  ;;  %v737_v44 = vld [vmem:[%s1134_s1 + $0x2] sm:$0x3]  ;;  %v1081_v47 = vld [vmem:[%s1140_s7] ss:$0 sm:$0xff] }
  0x1b   :  { %220 = vmatpush.msra.mxu3 %v104_v6  ;;  %337 = vmatpush.msrb.mxu0 %v105_v5 }
  0x1c   :  { %162 = vmatpush.msrb.mxu1 %v104_v6  ;;  %190 = vmatpush.msra.mxu2 %v103_v7 }
  0x1d   :  { %221 = vmatpush.msra.mxu3 %v103_v7  ;;  %338 = vmatpush.msrb.mxu0 %v104_v6 }
  0x1e   :  { %280 = vmatpush.msrb.mxu2 %v106_v3  ;;  %163 = vmatpush.msrb.mxu1 %v103_v7 }
  0x1f   :  { %306 = vmatpush.msrb.mxu3 %v106_v3  ;;  %727 = vmatmul.msk.f32.vlgmr.msrb.gmra.mxu1 %vm144_vm1, %v143_v8 }
  0x20   :  { %281 = vmatpush.msrb.mxu2 %v105_v5  ;;  %249 = vmatpush.msra.mxu1 %v106_v3 }
  0x21   :  { %307 = vmatpush.msrb.mxu3 %v105_v5  ;;  %339 = vmatpush.msrb.mxu0 %v103_v7 }
  0x22   :  { %282 = vmatpush.msrb.mxu2 %v104_v6  ;;  %250 = vmatpush.msra.mxu1 %v105_v5 }
  0x23   :  { %308 = vmatpush.msrb.mxu3 %v104_v6  ;;  %467 = vmatpush.msra.mxu0 %v1039_v37 }
  0x24   :  { %283 = vmatpush.msrb.mxu2 %v103_v7  ;;  %251 = vmatpush.msra.mxu1 %v104_v6 }
  0x25   :  { %309 = vmatpush.msrb.mxu3 %v103_v7  ;;  %468 = vmatpush.msra.mxu0 %v1041_v38 }
  0x26   :  { %252 = vmatpush.msra.mxu1 %v103_v7 }
  0x27   :  { %469 = vmatpush.msra.mxu0 %v1045_v39 }
  0x28   :  { %366 = vmatpush.msrb.mxu1 %v106_v3 }
  0x29   :  { %470 = vmatpush.msra.mxu0 %v1051_v40 }
  0x2a   :  { %367 = vmatpush.msrb.mxu1 %v105_v5 }
  0x2c   :  { %368 = vmatpush.msrb.mxu1 %v104_v6 }
  0x2e   :  { %369 = vmatpush.msrb.mxu1 %v103_v7 }
  0x94   :  { %v140_v10 = vpop.f32.mrf.mxu1  ;;  %v137_v12 = vpop.f32.mrf.mxu0 }
  0x95   :  { %v1028_v11 = vadd.f32 %v759_v9, %v140_v10  ;;  %v138_v13 = vadd.f32 %v759_v9, %v137_v12 }
  0x9c   :  { %v165_v14 = vpop.f32.mrf.mxu1 }
  0x9d   :  { %v168_v15 = vadd.f32 %v165_v14, %v138_v13  ;;  %v662_v14 = vld [vmem:[#allocation9 + $0x8] sm:$0xff] }
  0x9f   :  { %762 = vtanh.f32 %v168_v15  ;;  %v661_v15 = vld [vmem:[#allocation9] sm:$0xff] }
  0xa5   :  { %v763_v16 = vpop.eup %762 }
  0xa6   :  { %171 = vst.msk [vmem:[#allocation2] sm:$0x3] %vm170_vm2, %v763_v16  ;;  %728 = vmatmul.msk.f32.vlgmr.msra.gmra.mxu2 %vm144_vm1, %v763_v16 }
  0xa7   :  { %413 = vmatpush.msra.mxu2 %v384_v27 }
  0xa9   :  { %414 = vmatpush.msra.mxu2 %v383_v28 }
  0xab   :  { %415 = vmatpush.msra.mxu2 %v382_v29 }
  0xad   :  { %416 = vmatpush.msra.mxu2 %v381_v30 }
 0x129   :  { %v192_v17 = vpop.f32.mrf.mxu2 }
 0x12a   :  { %v196_v18 = vrot.slane %v192_v17, 6 }
 0x12c   :  { %v198_v19 = vadd.f32 %v196_v18, %v138_v13 }
 0x12e   :  { %764 = vtanh.f32 %v198_v19 }
 0x134   :  { %v765_v20 = vpop.eup %764 }
 0x135   :  { %201 = vst.msk [vmem:[#allocation2] sm:$0xc] %vm200_vm3, %v765_v20  ;;  %v203_v21 = vrot.slane %v765_v20, 2 }
 0x137   :  { %729 = vmatmul.msk.f32.vlgmr.msra.gmra.mxu3 %vm144_vm1, %v203_v21 }
 0x138   :  { %441 = vmatpush.msra.mxu3 %v1039_v37 }
 0x13a   :  { %442 = vmatpush.msra.mxu3 %v1041_v38 }
 0x13c   :  { %443 = vmatpush.msra.mxu3 %v1045_v39 }
 0x13e   :  { %444 = vmatpush.msra.mxu3 %v1051_v40 }
 0x1ba   :  { %v223_v22 = vpop.f32.mrf.mxu3 }
 0x1bb   :  { %v227_v23 = vrot.slane %v223_v22, 4 }
 0x1bd   :  { %v229_v24 = vadd.f32 %v227_v23, %v138_v13 }
 0x1bf   :  { %766 = vtanh.f32 %v229_v24 }
 0x1c5   :  { %v767_v25 = vpop.eup %766 }
 0x1c6   :  { %232 = vst.msk [vmem:[#allocation2] sm:$0x30] %vm231_vm4, %v767_v25  ;;  %v234_v26 = vrot.slane %v767_v25, 4 }
 0x1c8   :  { %730 = vmatmul.msk.f32.vlgmr.msra.gmra.mxu1 %vm144_vm1, %v234_v26  ;;  %v761_v26 = vld [vmem:[%s1142_s9] ss:$0 sm:$0xff]  ;;  %s928_s9 = smov [#allocation11]  }
 0x1c9   :  { %497 = vmatpush.msra.mxu1 %v1039_v37  ;;  %s706_s15 = sshll.u32 %s928_s9, 4  ;;  %s707_s15 = int_to_ptr.vmem [resolvable:$true] %s706_s15 }
 0x1cb   :  { %498 = vmatpush.msra.mxu1 %v1041_v38 }
 0x1cd   :  { %499 = vmatpush.msra.mxu1 %v1045_v39 }
 0x1cf   :  { %500 = vmatpush.msra.mxu1 %v1051_v40 }
 0x245   :  { %v254_v31 = vpop.f32.mrf.mxu1 }
 0x246   :  { %v258_v32 = vrot.slane %v254_v31, 2 }
 0x248   :  { %v260_v33 = vadd.f32 %v258_v32, %v138_v13  ;;  %v663_v13 = vld [vmem:[#allocation9 + $0x10] sm:$0xff] }
 0x24a   :  { %768 = vtanh.f32 %v260_v33 }
 0x250   :  { %v769_v34 = vpop.eup %768 }
 0x251   :  { %263 = vst.msk [vmem:[#allocation2] sm:$0xc0] %vm262_vm5, %v769_v34  ;;  %v265_v35 = vrot.slane %v769_v34, 6 }
 0x253   :  { %731 = vmatmul.msk.f32.vlgmr.msrb.gmra.mxu2 %vm144_vm1, %v265_v35 }
 0x254   :  { %613 = vmatpush.msrb.mxu2 %v1039_v37 }
 0x256   :  { %614 = vmatpush.msrb.mxu2 %v1041_v38 }
 0x258   :  { %v390_v36 = vld [vmem:[#allocation2] sm:$0xff]  ;;  %615 = vmatpush.msrb.mxu2 %v1045_v39 }
 0x25a   :  { %616 = vmatpush.msrb.mxu2 %v1051_v40 }
 0x25b   :  { %735 = vmatmul.msk.f32.vlgmr.msra.gmra.mxu2 %vm144_vm1, %v390_v36 }
 0x2d6   :  { %v285_v41 = vpop.f32.mrf.mxu2 }
 0x2d7   :  { %v288_v42 = vadd.f32 %v285_v41, %v1028_v11 }
 0x2d9   :  { %770 = vtanh.f32 %v288_v42 }
 0x2de   :  { %v418_v49 = vpop.f32.mrf.mxu2 }
 0x2df   :  { %v771_v43 = vpop.eup %770  ;;  %v419_v50 = vadd.f32 %v1081_v47, %v418_v49 }
 0x2e0   :  { %290 = vst.msk [vmem:[#allocation2 + $0x8] sm:$0x3] %vm170_vm2, %v771_v43  ;;  %732 = vmatmul.msk.f32.vlgmr.msrb.gmra.mxu3 %vm144_vm1, %v771_v43 }
 0x2e1   :  { %527 = vmatpush.msrb.mxu3 %v1039_v37 }
 0x2e3   :  { %528 = vmatpush.msrb.mxu3 %v1041_v38 }
 0x2e5   :  { %529 = vmatpush.msrb.mxu3 %v1045_v39 }
 0x2e7   :  { %530 = vmatpush.msrb.mxu3 %v1051_v40 }
 0x2e8   :  { %738 = vmatmul.msk.f32.vlgmr.msra.gmra.mxu3 %vm144_vm1, %v737_v44 }
 0x2e9   :  { %643 = vmatpush.msra.mxu3 %v1039_v37 }
 0x2eb   :  { %644 = vmatpush.msra.mxu3 %v1041_v38 }
 0x2ed   :  { %645 = vmatpush.msra.mxu3 %v1045_v39 }
 0x2ef   :  { %646 = vmatpush.msra.mxu3 %v1051_v40 }
 0x363   :  { %v311_v45 = vpop.f32.mrf.mxu3 }
 0x364   :  { %v315_v46 = vrot.slane %v311_v45, 6 }
 0x366   :  { %v317_v48 = vadd.f32 %v315_v46, %v1028_v11 }
 0x368   :  { %772 = vtanh.f32 %v317_v48 }
 0x36b   :  { %v446_v51 = vpop.f32.mrf.mxu3 }
 0x36c   :  { %v449_v52 = vadd.f32 %v446_v51, %v419_v50 }
 0x36e   :  { %v773_v53 = vpop.eup %772  ;;  %774 = vtanh.f32 %v449_v52 }
 0x36f   :  { %319 = vst.msk [vmem:[#allocation2 + $0x8] sm:$0xc] %vm200_vm3, %v773_v53  ;;  %v321_v54 = vrot.slane %v773_v53, 2 }
 0x371   :  { %733 = vmatmul.msk.f32.vlgmr.msrb.gmra.mxu0 %vm144_vm1, %v321_v54 }
 0x372   :  { %557 = vmatpush.msrb.mxu0 %v1039_v37 }
 0x374   :  { %v775_v55 = vpop.eup %774  ;;  %558 = vmatpush.msrb.mxu0 %v1041_v38 }
 0x375   :  { %451 = vst.msk [vmem:[#allocation2] sm:$0x3] %vm170_vm2, %v775_v55 }
 0x376   :  { %559 = vmatpush.msrb.mxu0 %v1045_v39 }
 0x378   :  { %560 = vmatpush.msrb.mxu0 %v1051_v40 }
 0x379   :  { %739 = vmatmul.msk.f32.vlgmr.msra.gmra.mxu0 %vm144_vm1, %v775_v55 }
 0x3ee   :  { %v341_v56 = vpop.f32.mrf.mxu0 }
 0x3ef   :  { %v345_v57 = vrot.slane %v341_v56, 4 }
 0x3f1   :  { %v347_v58 = vadd.f32 %v345_v57, %v1028_v11 }
 0x3f3   :  { %776 = vtanh.f32 %v347_v58 }
 0x3f6   :  { %v472_v59 = vpop.f32.mrf.mxu0 }
 0x3f7   :  { %v476_v60 = vrot.slane %v472_v59, 6 }
 0x3f9   :  { %v777_v61 = vpop.eup %776  ;;  %v478_v62 = vadd.f32 %v476_v60, %v419_v50 }
 0x3fa   :  { %349 = vst.msk [vmem:[#allocation2 + $0x8] sm:$0x30] %vm231_vm4, %v777_v61  ;;  %v351_v63 = vrot.slane %v777_v61, 4 }
 0x3fb   :  { %778 = vtanh.f32 %v478_v62 }
 0x3fc   :  { %734 = vmatmul.msk.f32.vlgmr.msrb.gmra.mxu1 %vm144_vm1, %v351_v63 }
 0x3fd   :  { %583 = vmatpush.msrb.mxu1 %v1039_v37 }
 0x3ff   :  { %584 = vmatpush.msrb.mxu1 %v1041_v38 }
 0x401   :  { %v779_v0 = vpop.eup %778  ;;  %585 = vmatpush.msrb.mxu1 %v1045_v39 }
 0x402   :  { %v482_v1 = vrot.slane %v779_v0, 2  ;;  %480 = vst.msk [vmem:[#allocation2] sm:$0xc] %vm200_vm3, %v779_v0 }
 0x403   :  { %586 = vmatpush.msrb.mxu1 %v1051_v40 }
 0x404   :  { %740 = vmatmul.msk.f32.vlgmr.msra.gmra.mxu1 %vm144_vm1, %v482_v1 }
 0x479   :  { %v371_v2 = vpop.f32.mrf.mxu1 }
 0x47a   :  { %v375_v3 = vrot.slane %v371_v2, 2 }
 0x47c   :  { %v377_v4 = vadd.f32 %v375_v3, %v1028_v11  ;;  %v664_v11 = vld [vmem:[#allocation9 + $0x18] sm:$0xff] }
 0x47d   :  { %687 = vmatpush.msra.mxu0 %v664_v11 }
 0x47e   :  { %780 = vtanh.f32 %v377_v4 }
 0x47f   :  { %688 = vmatpush.msra.mxu0 %v663_v13 }
 0x481   :  { %v502_v5 = vpop.f32.mrf.mxu1  ;;  %689 = vmatpush.msra.mxu0 %v662_v14 }
 0x482   :  { %v506_v6 = vrot.slane %v502_v5, 4 }
 0x483   :  { %690 = vmatpush.msra.mxu0 %v661_v15 }
 0x484   :  { %v781_v7 = vpop.eup %780  ;;  %v508_v8 = vadd.f32 %v506_v6, %v419_v50 }
 0x485   :  { %379 = vst.msk [vmem:[#allocation2 + $0x8] sm:$0xc0] %vm262_vm5, %v781_v7 }
 0x486   :  { %380 = vst.msk [vmem:[#allocation11 - $0x6] sm:$0xc0] %vm262_vm5, %v781_v7  ;;  %782 = vtanh.f32 %v508_v8 }
 0x48c   :  { %v783_v9 = vpop.eup %782  ;;  %v391_v10 = vld [vmem:[#allocation2 + $0x8] sm:$0xff] }
 0x48d   :  { %v512_v12 = vrot.slane %v783_v9, 4  ;;  %510 = vst.msk [vmem:[#allocation2] sm:$0x30] %vm231_vm4, %v783_v9  ;;  %736 = vmatmul.msk.f32.gmra.mxu2 %vm144_vm1, %v391_v10 }
 0x48f   :  { %741 = vmatmul.msk.f32.vlgmr.msrb.gmra.mxu3 %vm144_vm1, %v512_v12 }
 0x510   :  { %v421_v22 = vpop.f32.mrf.mxu2 }
 0x511   :  { %v422_v23 = vadd.f32 %v1081_v47, %v421_v22 }
 0x512   :  { %v532_v16 = vpop.f32.mrf.mxu3 }
 0x513   :  { %v536_v17 = vrot.slane %v532_v16, 2 }
 0x515   :  { %v538_v18 = vadd.f32 %v536_v17, %v419_v50 }
 0x517   :  { %784 = vtanh.f32 %v538_v18 }
 0x51d   :  { %v785_v19 = vpop.eup %784 }
 0x51e   :  { %v542_v20 = vrot.slane %v785_v19, 6  ;;  %540 = vst.msk [vmem:[#allocation2] sm:$0xc0] %vm262_vm5, %v785_v19 }
 0x520   :  { %742 = vmatmul.msk.f32.vlgmr.msrb.gmra.mxu0 %vm144_vm1, %v542_v20 }
 0x525   :  { %v659_v21 = vld [vmem:[#allocation2] sm:$0xff] }
 0x528   :  { %746 = vmatmul.msk.f32.vlgmr.msra.gmra.mxu0 %vm144_vm1, %v659_v21 }
 0x59d   :  { %v562_v24 = vpop.f32.mrf.mxu0 }
 0x59e   :  { %v565_v25 = vadd.f32 %v562_v24, %v422_v23 }
 0x5a0   :  { %786 = vtanh.f32 %v565_v25 }
 0x5a5   :  { %v692_v27 = vpop.f32.mrf.mxu0 }
 0x5a6   :  { %v787_v28 = vpop.eup %786  ;;  %v693_v29 = vadd.f32 %v761_v26, %v692_v27 }
 0x5a7   :  { %567 = vst.msk [vmem:[#allocation2 + $0x8] sm:$0x3] %vm170_vm2, %v787_v28  ;;  %743 = vmatmul.msk.f32.vlgmr.msrb.gmra.mxu1 %vm144_vm1, %v787_v28 }
 0x5a8   :  { %698 = vst [vmem:[%s1143_s10] sm:$0xff] %v693_v29 }
 0x624   :  { %v588_v30 = vpop.f32.mrf.mxu1 }
 0x625   :  { %v592_v31 = vrot.slane %v588_v30, 6 }
 0x627   :  { %v594_v32 = vadd.f32 %v592_v31, %v422_v23 }
 0x629   :  { %788 = vtanh.f32 %v594_v32 }
 0x62f   :  { %v789_v33 = vpop.eup %788 }
 0x630   :  { %v598_v34 = vrot.slane %v789_v33, 2  ;;  %596 = vst.msk [vmem:[#allocation2 + $0x8] sm:$0xc] %vm200_vm3, %v789_v33 }
 0x632   :  { %744 = vmatmul.msk.f32.vlgmr.msrb.gmra.mxu2 %vm144_vm1, %v598_v34 }
 0x6b5   :  { %v618_v35 = vpop.f32.mrf.mxu2 }
 0x6b6   :  { %v622_v36 = vrot.slane %v618_v35, 4 }
 0x6b8   :  { %v624_v37 = vadd.f32 %v622_v36, %v422_v23 }
 0x6ba   :  { %790 = vtanh.f32 %v624_v37 }
 0x6c0   :  { %v791_v38 = vpop.eup %790 }
 0x6c1   :  { %v628_v39 = vrot.slane %v791_v38, 4  ;;  %626 = vst.msk [vmem:[#allocation2 + $0x8] sm:$0x30] %vm231_vm4, %v791_v38 }
 0x6c3   :  { %745 = vmatmul.msk.f32.vlgmr.msra.gmra.mxu3 %vm144_vm1, %v628_v39 }
 0x746   :  { %v648_v40 = vpop.f32.mrf.mxu3 }
 0x747   :  { %v652_v41 = vrot.slane %v648_v40, 2 }
 0x749   :  { %v654_v42 = vadd.f32 %v652_v41, %v422_v23 }
 0x74b   :  { %792 = vtanh.f32 %v654_v42 }
 0x751   :  { %v793_v43 = vpop.eup %792 }
 0x752   :  { %656 = vst.msk [vmem:[#allocation2 + $0x8] sm:$0xc0] %vm262_vm5, %v793_v43 }
 0x753   :  { %658 = vst.msk [vmem:[#allocation11 - $0x4] sm:$0xc0] %vm262_vm5, %v793_v43 }
 0x754   :  { %714 = dma.vmem_to_hbm [thread:$0]  %s707_s15, 64, %s709_s17, [#allocation5], %s929_s6, %s929_s6, %s930_s8  }
 0x759   :  { %v660_v44 = vld [vmem:[#allocation2 + $0x8] sm:$0xff] }
 0x75a   :  { %747 = vmatmul.msk.f32.gmra.mxu0 %vm144_vm1, %v660_v44 }
 0x7d7   :  { %v695_v45 = vpop.f32.mrf.mxu0 }
 0x7d8   :  { %v696_v46 = vadd.f32 %v761_v26, %v695_v45 }
 0x7da   :  { %699 = vst [vmem:[%s1143_s10 + $0x8] sm:$0xff] %v696_v46 }
 0x7db   :  { %920 = dma.done.wait [#allocation5], 64  }
 0x7dc   :  { %921 = vsyncadd [#allocation5], 4294967232 }
 0x7dd   :  { %721 = vsyncpa [#allocation4], 1 }
 0x7de   :  { %722 = vsyncpa [#allocation7], 1 }
 0x7df   :  { %723 = vsyncpa [#allocation10], 1 }
 0x7e0   :  { %724 = vsyncpa [#allocation5], 1 }

</bundles_post_ra>
